<compile_context>
chip_gen: v7x
topology: tpu7x:2x2x1
jax: 0.10.0
libtpu: 0.0.40
codegen_flags: <defaults>
</compile_context>

<pallas_src>
import jax
import jax.numpy as jnp
from jax.experimental import pallas as pl
from jax.experimental.pallas import tpu as pltpu


def _round_up(x: int, m: int) -> int:
    return ((x + m - 1) // m) * m


def _gram_tile_kernel(xm_ref, xut_ref, out_ref):
    # xm_ref : [TM, 3]  rows of (xu @ M)
    # xut_ref: [3, TN]  columns of xu (i.e. xu.T) -- already MXU-natural [K, N]
    # out    : [TM, TN] = xm @ xu.T   (single K=3 MXU matmul, no transposes)
    out_ref[...] = jnp.dot(
        xm_ref[...], xut_ref[...], preferred_element_type=jnp.float32
    )


_TM_CAP = 512    # output-tile rows (multiple of 8)
_TN_CAP = 2048   # output-tile cols (multiple of 128, lane-dense writeback)
_SMALL_B = 1024  # below this, plain XLA beats the pallas_call launch overhead


def double_integrator_reward(xu, wq, wr, *, force_pallas=False):
    """out[i, j] = xu[i] @ blockdiag(wq, wr) @ xu[j]   -> [B, B] float32."""
    B, F = xu.shape
    assert F == 3

    xu = xu.astype(jnp.float32)

    # Fold the tiny deterministic weights into one 3x3 block-diagonal matrix
    # (exactly equivalent: the off-diagonal blocks are zero) and apply once
    # in plain XLA -> the kernel sees only activations.
    m = jnp.zeros((3, 3), dtype=jnp.float32)
    m = m.at[0:2, 0:2].set(wq.astype(jnp.float32))
    m = m.at[2:3, 2:3].set(wr.astype(jnp.float32))
    xu_m = xu @ m                                   # [B, 3]

    # Small-B fast path: launch / pad / slice overheads dominate; let XLA
    # fuse the tiny gram matmul.
    if not force_pallas and B <= _SMALL_B:
        return xu_m @ xu.T

    # ---------------- Pallas path (HBM-writeback bound) ----------------
    # Minimal padding: rows to a multiple of 8, cols to a multiple of 128.
    # Edge tiles overhang the (8/128-padded) extents and are masked on store.
    m_rows = _round_up(B, 8)
    n_cols = _round_up(B, 128)
    tm = min(_TM_CAP, m_rows)
    tn = min(_TN_CAP, n_cols)

    xm_p = xu_m if m_rows == B else (
        jnp.zeros((m_rows, 3), jnp.float32).at[:B, :].set(xu_m))
    xu_t = xu.T                                     # [3, B]  (free transpose)
    xut_p = xu_t if n_cols == B else (
        jnp.zeros((3, n_cols), jnp.float32).at[:, :B].set(xu_t))

    grid = (pl.cdiv(m_rows, tm), pl.cdiv(n_cols, tn))

    # VMEM (double-buffered): out 2*tm*tn*4 <= 8 MiB, lhs ~0.5 MiB,
    # rhs ~0.13 MiB  -> under the 16 MiB scoped default even on v5e.
    out_padded = pl.pallas_call(
        _gram_tile_kernel,
        out_shape=jax.ShapeDtypeStruct((m_rows, n_cols), jnp.float32),
        grid=grid,
        in_specs=[
            pl.BlockSpec((tm, 3), lambda i, j: (i, 0)),   # (xu @ M) rows
            pl.BlockSpec((3, tn), lambda i, j: (0, j)),   # xu.T columns
        ],
        out_specs=pl.BlockSpec((tm, tn), lambda i, j: (i, j)),
        compiler_params=pltpu.CompilerParams(
            dimension_semantics=("parallel", "parallel"),
        ),
        cost_estimate=pl.CostEstimate(
            flops=6 * m_rows * n_cols,
            transcendentals=0,
            bytes_accessed=4 * m_rows * n_cols + 12 * (m_rows + n_cols),
        ),
    )(xm_p, xut_p)

    if m_rows == B and n_cols == B:
        return out_padded
    # TODO(synk): for unaligned B this slice is an extra HBM copy of the
    # [B,B] result; consumers that can accept the 8/128-padded output should
    # take out_padded directly.
    return out_padded[:B, :B]


if __name__ == "__main__":
    key = jax.random.PRNGKey(0)
    k_small, k_mid = jax.random.split(key)

    # Deterministic parameter init per the module's __init__.
    wq = jnp.eye(2, dtype=jnp.float32)   # self.Q.weight
    wr = jnp.eye(1, dtype=jnp.float32)   # self.R.weight

    def torch_ref(xu):
        # Faithful to the PyTorch forward; gram terms done with a VPU
        # broadcast-reduce so the reference is matmul-precision independent.
        x, u = xu[:, 0:2], xu[:, 2:3]
        qx = x @ wq.T                                    # [B, 2]
        ru = u @ wr.T                                    # [B, 1]
        t1 = jnp.sum(x[:, None, :] * qx[None, :, :], axis=-1)
        t2 = jnp.sum(u[:, None, :] * ru[None, :, :], axis=-1)
        return t1 + t2

    # 1) Small demo shape (B=8): force the Pallas path (single 8x128 output
    #    block) and also check the default XLA fast path.
    xu_small = jax.random.normal(k_small, (8, 3), dtype=jnp.float32)
    out_kernel = jax.block_until_ready(
        double_integrator_reward(xu_small, wq, wr, force_pallas=True))
    out_fast = jax.block_until_ready(
        double_integrator_reward(xu_small, wq, wr))
    ref_small = torch_ref(xu_small)
    assert out_kernel.shape == (8, 8)
    assert jnp.allclose(out_kernel, ref_small, atol=1e-4, rtol=1e-4)
    assert jnp.allclose(out_fast, ref_small, atol=1e-4, rtol=1e-4)

    # 2) Unaligned B with a multi-tile grid (B=520): exercises the minimal
    #    8/128 padding, an overhanging masked edge block on the row axis,
    #    and the final [:B,:B] slice.
    xu_mid = jax.random.normal(k_mid, (520, 3), dtype=jnp.float32)
    out_mid = jax.block_until_ready(
        double_integrator_reward(xu_mid, wq, wr, force_pallas=True))
    ref_mid = torch_ref(xu_mid)
    assert out_mid.shape == (520, 520)
    assert jnp.allclose(out_mid, ref_mid, atol=1e-4, rtol=1e-4)

    print("KERNEL_OK")
</pallas_src>

<mosaic_0001>
module attributes {stable_mosaic.version = 11 : i64} {
  func.func @_gram_tile_kernel(%arg0: i32, %arg1: i32, %arg2: memref<8x3xf32, #tpu.memory_space<vmem>>, %arg3: memref<3x128xf32, #tpu.memory_space<vmem>>, %arg4: memref<8x128xf32, #tpu.memory_space<vmem>>) attributes {dimension_semantics = [#tpu.dimension_semantics<parallel>, #tpu.dimension_semantics<parallel>], iteration_bounds = array<i64: 1, 1>, scalar_prefetch = 0 : i64, scratch_operands = 0 : i64, tpu.core_type = #tpu.core_type<tc>, window_params = [{transform_indices = @transform_0, window_bounds = array<i64: 8, 3>}, {transform_indices = @transform_1, window_bounds = array<i64: 3, 128>}, {transform_indices = @transform_2, window_bounds = array<i64: 8, 128>}]} {
    %c0 = arith.constant 0 : index
    %c0_0 = arith.constant 0 : index
    %0 = vector.load %arg2[%c0, %c0_0] : memref<8x3xf32, #tpu.memory_space<vmem>>, vector<8x3xf32>
    %c0_1 = arith.constant 0 : index
    %c0_2 = arith.constant 0 : index
    %1 = vector.load %arg3[%c0_1, %c0_2] : memref<3x128xf32, #tpu.memory_space<vmem>>, vector<3x128xf32>
    %cst = arith.constant dense<0.000000e+00> : vector<8x128xf32>
    %2 = tpu.matmul %0, %1, %cst {dimension_numbers = #tpu.dot_dimension_numbers<[1], [0], [0], [1], [0, 0, 1, 1], [], []>} : vector<8x3xf32>, vector<3x128xf32>, vector<8x128xf32> -> vector<8x128xf32>
    %c0_3 = arith.constant 0 : index
    %c0_4 = arith.constant 0 : index
    %3 = vector.load %arg4[%c0_3, %c0_4] : memref<8x128xf32, #tpu.memory_space<vmem>>, vector<8x128xf32>
    tpu.vector_store %arg4[%c0_3, %c0_4], %2 {strides = array<i32>} : memref<8x128xf32, #tpu.memory_space<vmem>>, vector<8x128xf32>,
    return
  }
  func.func @transform_0(%arg0: i32, %arg1: i32) -> (i32, i32) {
    %c0_i32 = arith.constant 0 : i32
    %c0_i32_0 = arith.constant 0 : i32
    return %arg0, %c0_i32 : i32, i32
  }
  func.func @transform_1(%arg0: i32, %arg1: i32) -> (i32, i32) {
    %c0_i32 = arith.constant 0 : i32
    %c0_i32_0 = arith.constant 0 : i32
    return %c0_i32, %arg1 : i32, i32
  }
  func.func @transform_2(%arg0: i32, %arg1: i32) -> (i32, i32) {
    %c0_i32 = arith.constant 0 : i32
    return %arg0, %arg1 : i32, i32
  }
}

</mosaic_0001>

<bundles_post_ra>
// kernel: tpu_custom_call.1
= control target key start
LH: loop header
LB: loop body
LE: loop exit
PB: predicated region body
PF: predicated region fallthrough
CT: control target
= control target key end

     0   :  { %vm18_vm0 = vcmask 1042432   ;;  %v143_v2 = vmov 0.0   ;;  %vm144_vm1 = vmmov 0   ;;  %vm14_vm2 = vcmask 23552   ;;  %s179_s0 = inlined_call_operand.vmem [shape: f32[8,3], index: 0, kind: input, shape index: {}]   ;;  %s180_s1 = inlined_call_operand.vmem [shape: f32[3,128], index: 1, kind: input, shape index: {}]   ;;  %s181_s2 = inlined_call_operand.hbm [shape: f32[8,128], index: 2, kind: output, shape index: {}]  }
   0x1   :  { %v13_v0 = vld [vmem:[%s180_s1] sm:$0x7]  ;;  %111 = vmatprep.subr.mxu0 %v143_v2  ;;  %113 = vmatprep.mubr.msk.f32.mxu0 %vm144_vm1, %v143_v2 }
   0x2   :  { %v12_v1 = vld [vmem:[%s179_s0] sm:$0xff] }
   0x3   :  { %7 = vsyncpa [#allocation3], 0  ;;  %112 = vmatpush3.msk.msra.mxu0 %vm18_vm0, %v13_v0  ;;  %s145_s13 = smov [#allocation2]  }
   0x4   :  { %114 = vmatmul.mubr.msk.f32.vlgmr.msra.gmra.mrb[0].mxu0 %vm14_vm2, %v12_v1  ;;  %s99_s14 = sshll.u32 %s145_s13, 4  ;;  %s100_s14 = int_to_ptr.vmem [resolvable:$true] %s99_s14 }
   0x5   :  { %s119_s1 = scalar_lea.vmem %s100_s14, 128  ;;  %p124_p1 = scmp.lt.s32.totalorder %s100_s14, %s100_s14 }
   0x6   :  { %p120_p0 = scmp.ne.s32.totalorder %s100_s14, %s119_s1  ;;  %p125_p2 = scmp.lt.s32.totalorder %s119_s1, %s119_s1 }
   0x8   :  { %p126_p3 = por %p125_p2, %p124_p1 }
   0xa   :  { %p127_p4 = pnand %p126_p3, %p120_p0 }
  0xd7   :  { %v88_v3 = vpop.f32.mrb[0].mxu0 }
  0xd8   :  { %92 = vst [vmem:[#allocation2] sm:$0xff] %v88_v3  ;;  %v115_v4 = vpop.f32.mrb[1].mxu0 }
  0xd9   :  { %130 = shalt.err (!%p127_p4)
}
  0xda   :  { %s131_s16 = scalar_lea.hbm %s181_s2, 128 }
  0xdb   :  { %p132_p5 = scmp.ne.s32.totalorder %s181_s2, %s131_s16  ;;  %p135_p6 = scmp.lt.u32.totalorder %s131_s16, %s181_s2 }
  0xdd   :  { %p137_p7 = pnand %p135_p6, %p132_p5 }
  0xdf   :  { %140 = shalt.err (!%p137_p7)
}
  0xe0   :  { %102 = dma.vmem_to_hbm [thread:$0]  %s100_s14, 128, %s181_s2, [#allocation3]  }
  0xe1   :  { %141 = dma.done.wait [#allocation3], 128  }
  0xe2   :  { %142 = vsyncadd [#allocation3], 4294967168 }
  0xe3   :  { %106 = vsyncpa [#allocation3], 1 }

</bundles_post_ra>
